<compile_context>
chip_gen: v7x
topology: tpu7x:2x2x1
jax: 0.10.0
libtpu: 0.0.40
codegen_flags: <defaults>
</compile_context>

<pallas_src>
import functools

import jax
import jax.numpy as jnp
from jax import lax
from jax.experimental import pallas as pl
from jax.experimental.pallas import tpu as pltpu

_LANE = 128


def _cdiv(a, b):
    return (a + b - 1) // b


def _dice_loss_kernel(logit_ref, tgt_ref, out_ref, acc_ref, *,
                      num_classes, chunk_rows, n_full_chunks, rem_rows,
                      tile_rows, rows_total, smooth,
                      mask_rows, mask_lanes, unroll):
    i = pl.program_id(1)
    last_i = pl.num_programs(1) - 1

    @pl.when(i == 0)
    def _init():
        acc_ref[...] = jnp.zeros_like(acc_ref)

    smooth_f = jnp.float32(smooth)

    def compute_chunk(r0, nrows, masked):
        tgt = tgt_ref[0, pl.ds(r0, nrows), :]                  # (nrows,128) i32
        # Load each channel exactly once; reused by max pass and exp pass.
        xs = [logit_ref[0, c, pl.ds(r0, nrows), :].astype(jnp.float32)
              for c in range(num_classes)]
        m = xs[0]
        for c in range(1, num_classes):
            m = jnp.maximum(m, xs[c])
        s = jnp.zeros_like(m)        # sum_c exp
        s2 = jnp.zeros_like(m)       # sum_c exp^2
        et = jnp.zeros_like(m)       # exp at the target channel
        for c in range(num_classes):
            e = jnp.exp(xs[c] - m)
            s = s + e
            s2 = s2 + e * e
            # NB: out-of-range targets silently give et=0 (loss ~ 1) instead of
            # erroring like torch scatter_ would.
            et = et + jnp.where(tgt == c, e, jnp.float32(0.0))
        ss = s * s
        # Folded softmax-dice: (e_t*s + smooth*s^2) / (s2 + (1+smooth)*s^2);
        # sum(select^2) == 1 is folded in.
        num = et * s + smooth_f * ss
        den = s2 + (1.0 + smooth_f) * ss
        loss = 1.0 - num * pl.reciprocal(den, approx=True)
        if masked:
            valid = None
            if mask_rows:
                row_ids = r0 + lax.broadcasted_iota(jnp.int32, (nrows, _LANE), 0)
                valid = (i * tile_rows + row_ids) < rows_total
            if mask_lanes:
                lane_ok = tgt >= 0
                valid = lane_ok if valid is None else jnp.logical_and(valid, lane_ok)
            if valid is not None:
                loss = jnp.where(valid, loss, jnp.float32(0.0))
        return loss

    def accumulate(masked):
        if n_full_chunks > 0:
            def body(ci, carry):
                r0 = pl.multiple_of(ci * chunk_rows, chunk_rows)
                return carry + compute_chunk(r0, chunk_rows, masked)
            partial = lax.fori_loop(
                0, n_full_chunks, body,
                jnp.zeros((chunk_rows, _LANE), jnp.float32), unroll=unroll)
            acc_ref[...] += partial
        if rem_rows > 0:
            tail = compute_chunk(n_full_chunks * chunk_rows, rem_rows, masked)
            acc_ref[pl.ds(0, 1), :] = (acc_ref[pl.ds(0, 1), :]
                                       + jnp.sum(tail, axis=0, keepdims=True))

    if mask_rows or mask_lanes:
        # Full tiles skip the per-pixel validity select entirely.
        @pl.when(i != last_i)
        def _full_tiles():
            accumulate(False)

        @pl.when(i == last_i)
        def _ragged_tile():
            accumulate(True)
    else:
        accumulate(False)

    @pl.when(i == last_i)
    def _finalize():
        # Per-batch partial sums, lane-resident; summed + averaged in wrapper.
        out_ref[...] = jnp.sum(acc_ref[...], axis=0,
                               keepdims=True).reshape(1, 1, _LANE)


def dice_loss_2d(logit_nchw, target_bhw, *, smooth=1.0):
    """DiceLoss2D(smooth, size_average=True)(logit, target, type='softmax')."""
    B, C, H, W = logit_nchw.shape
    HW = H * W
    n_valid = B * HW

    rows = _cdiv(HW, _LANE)
    hw_pad = rows * _LANE
    mask_lanes = hw_pad != HW

    # Free reshapes of the NCHW input; pad only when HW is not lane-aligned.
    logit_flat = logit_nchw.reshape(B, C, HW)
    target_flat = target_bhw.reshape(B, HW).astype(jnp.int32)
    if mask_lanes:
        # TODO(synk): this copies the logits once in HBM; a pad-free path for
        # HW % 128 != 0 would need an in-kernel ragged gather.
        pad = hw_pad - HW
        logit_flat = jnp.pad(logit_flat, ((0, 0), (0, 0), (0, pad)))
        target_flat = jnp.pad(target_flat, ((0, 0), (0, pad)),
                              constant_values=-1)
    logit_tiled = logit_flat.reshape(B, C, rows, _LANE)
    target_tiled = target_flat.reshape(B, rows, _LANE)

    # Inner compute chunk: largest of {32,16,8} rows with C*chunk_rows <= 256
    # (keeps the per-chunk channel working set within ~32 vregs).
    chunk_rows = 8
    for cand in (32, 16, 8):
        if C * cand <= 256:
            chunk_rows = cand
            break

    # Per-step tile: double-buffered in-spec footprint 2*(C+1)*tile_rows*512 B,
    # capped at 24 MiB (fits v7x scoped VMEM) and 2048 rows.
    budget_bytes = 24 * 1024 * 1024
    cap_rows = budget_bytes // (2 * (C + 1) * _LANE * 4)
    cap_rows = max(chunk_rows, (min(2048, cap_rows) // chunk_rows) * chunk_rows)

    if rows <= cap_rows:
        tile_rows = rows            # one row-tile per image; no ragged tile
        mask_rows = False
    else:
        tile_rows = cap_rows        # multiple of chunk_rows (and of 8)
        mask_rows = rows % tile_rows != 0
    grid_i = _cdiv(rows, tile_rows)

    chunk_rows = min(chunk_rows, tile_rows)
    n_full_chunks = tile_rows // chunk_rows
    rem_rows = tile_rows % chunk_rows
    unroll = 4 if n_full_chunks >= 4 else max(n_full_chunks, 1)

    in_bytes = 2 * (C + 1) * tile_rows * _LANE * 4        # double-buffered
    vmem_limit = int(min(32 * 1024 * 1024,
                         max(16 * 1024 * 1024, in_bytes + 2 * 1024 * 1024)))

    kernel = functools.partial(
        _dice_loss_kernel,
        num_classes=C, chunk_rows=chunk_rows, n_full_chunks=n_full_chunks,
        rem_rows=rem_rows, tile_rows=tile_rows, rows_total=rows,
        smooth=float(smooth), mask_rows=mask_rows, mask_lanes=mask_lanes,
        unroll=unroll)

    partials = pl.pallas_call(
        kernel,
        out_shape=jax.ShapeDtypeStruct((B, 1, _LANE), jnp.float32),
        grid_spec=pltpu.PrefetchScalarGridSpec(
            num_scalar_prefetch=0,
            grid=(B, grid_i),
            in_specs=[
                pl.BlockSpec((1, C, tile_rows, _LANE),
                             lambda b, i: (b, 0, i, 0)),
                pl.BlockSpec((1, tile_rows, _LANE),
                             lambda b, i: (b, i, 0)),
            ],
            out_specs=pl.BlockSpec((1, 1, _LANE), lambda b, i: (b, 0, 0)),
            scratch_shapes=[pltpu.VMEM((chunk_rows, _LANE), jnp.float32)],
        ),
        compiler_params=pltpu.CompilerParams(
            dimension_semantics=("parallel", "arbitrary"),
            vmem_limit_bytes=vmem_limit),
    )(logit_tiled, target_tiled)

    # size_average=True -> mean over the B*H*W real pixels.
    return jnp.sum(partials) / jnp.float32(n_valid)


def _reference(logit_nchw, target_bhw, smooth=1.0):
    B, C, H, W = logit_nchw.shape
    x = jnp.transpose(logit_nchw, (0, 2, 3, 1)).reshape(-1, C).astype(jnp.float32)
    prob = jax.nn.softmax(x, axis=1)
    sel = jax.nn.one_hot(target_bhw.reshape(-1), C, dtype=jnp.float32)
    num = jnp.sum(prob * sel, axis=1) + smooth
    den = jnp.sum(prob ** 2 + sel ** 2, axis=1) + smooth
    return jnp.mean(1.0 - num / den)


if __name__ == "__main__":
    key = jax.random.PRNGKey(0)
    k_logit, k_tgt = jax.random.split(key)

    B, C, H, W = 2, 4, 16, 16
    logit = jax.random.normal(k_logit, (B, C, H, W), dtype=jnp.float32)
    target = jax.random.randint(k_tgt, (B, H, W), 0, C, dtype=jnp.int32)

    loss = dice_loss_2d(logit, target, smooth=1.0)
    loss = jax.block_until_ready(loss)

    ref = _reference(logit, target, smooth=1.0)
    # Tolerance relaxed from 1e-5 to 1e-4 because of the EUP approximate
    # reciprocal; dice values are O(0.5) so this is still a tight check.
    assert jnp.allclose(loss, ref, atol=1e-4, rtol=1e-4), (loss, ref)

    print("KERNEL_OK")
</pallas_src>

<mosaic_0001>
module attributes {stable_mosaic.version = 11 : i64} {
  func.func @_dice_loss_kernel(%arg0: i32, %arg1: i32, %arg2: memref<1x4x2x128xf32, #tpu.memory_space<vmem>>, %arg3: memref<1x2x128xi32, #tpu.memory_space<vmem>>, %arg4: memref<1x1x128xf32, #tpu.memory_space<vmem>>, %arg5: memref<2x128xf32, #tpu.memory_space<vmem>>) attributes {dimension_semantics = [#tpu.dimension_semantics<parallel>, #tpu.dimension_semantics<arbitrary>], iteration_bounds = array<i64: 2, 1>, scalar_prefetch = 0 : i64, scratch_operands = 1 : i64, tpu.core_type = #tpu.core_type<tc>, window_params = [{transform_indices = @transform_0, window_bounds = array<i64: 1, 4, 2, 128>}, {transform_indices = @transform_1, window_bounds = array<i64: 1, 2, 128>}, {transform_indices = @transform_2, window_bounds = array<i64: 1, 1, 128>}]} {
    %c0_i32 = arith.constant 0 : i32
    %0 = arith.cmpi eq, %arg1, %c0_i32 : i32
    %1 = arith.extui %0 : i1 to i32
    %c0_i32_0 = arith.constant 0 : i32
    %2 = arith.cmpi ne, %1, %c0_i32_0 : i32
    scf.if %2 {
      %cst_31 = arith.constant 0.000000e+00 : f32
      %87 = vector.broadcast %cst_31 : f32 to vector<2x128xf32>
      %c0_32 = arith.constant 0 : index
      %c0_33 = arith.constant 0 : index
      %88 = vector.load %arg5[%c0_32, %c0_33] : memref<2x128xf32, #tpu.memory_space<vmem>>, vector<2x128xf32>
      tpu.vector_store %arg5[%c0_32, %c0_33], %87 {strides = array<i32>} : memref<2x128xf32, #tpu.memory_space<vmem>>, vector<2x128xf32>,
    } else {
    }
    %cst = arith.constant 0.000000e+00 : f32
    %3 = vector.broadcast %cst : f32 to vector<2x128xf32>
    %cst_1 = arith.constant 1.000000e+00 : f32
    %c0_i32_2 = arith.constant 0 : i32
    %c2_i32 = arith.constant 2 : i32
    %4 = arith.muli %c0_i32_2, %c2_i32 : i32
    %5 = tpu.assume_multiple %4, 2 : i32
    %c0 = arith.constant 0 : index
    %6 = arith.index_cast %5 : i32 to index
    %c0_3 = arith.constant 0 : index
    %7 = vector.load %arg3[%c0, %6, %c0_3] : memref<1x2x128xi32, #tpu.memory_space<vmem>>, vector<1x2x128xi32>
    %8 = vector.shape_cast %7 : vector<1x2x128xi32> to vector<2x128xi32>
    %c0_4 = arith.constant 0 : index
    %c0_5 = arith.constant 0 : index
    %9 = arith.index_cast %5 : i32 to index
    %c0_6 = arith.constant 0 : index
    %10 = vector.load %arg2[%c0_4, %c0_5, %9, %c0_6] : memref<1x4x2x128xf32, #tpu.memory_space<vmem>>, vector<1x1x2x128xf32>
    %11 = vector.shape_cast %10 : vector<1x1x2x128xf32> to vector<2x128xf32>
    %c0_7 = arith.constant 0 : index
    %c1 = arith.constant 1 : index
    %12 = arith.index_cast %5 : i32 to index
    %c0_8 = arith.constant 0 : index
    %13 = vector.load %arg2[%c0_7, %c1, %12, %c0_8] : memref<1x4x2x128xf32, #tpu.memory_space<vmem>>, vector<1x1x2x128xf32>
    %14 = vector.shape_cast %13 : vector<1x1x2x128xf32> to vector<2x128xf32>
    %c0_9 = arith.constant 0 : index
    %c2 = arith.constant 2 : index
    %15 = arith.index_cast %5 : i32 to index
    %c0_10 = arith.constant 0 : index
    %16 = vector.load %arg2[%c0_9, %c2, %15, %c0_10] : memref<1x4x2x128xf32, #tpu.memory_space<vmem>>, vector<1x1x2x128xf32>
    %17 = vector.shape_cast %16 : vector<1x1x2x128xf32> to vector<2x128xf32>
    %c0_11 = arith.constant 0 : index
    %c3 = arith.constant 3 : index
    %18 = arith.index_cast %5 : i32 to index
    %c0_12 = arith.constant 0 : index
    %19 = vector.load %arg2[%c0_11, %c3, %18, %c0_12] : memref<1x4x2x128xf32, #tpu.memory_space<vmem>>, vector<1x1x2x128xf32>
    %20 = vector.shape_cast %19 : vector<1x1x2x128xf32> to vector<2x128xf32>
    %21 = arith.maximumf %11, %14 : vector<2x128xf32>
    %22 = arith.maximumf %21, %17 : vector<2x128xf32>
    %23 = arith.maximumf %22, %20 : vector<2x128xf32>
    %cst_13 = arith.constant 0.000000e+00 : f32
    %24 = vector.broadcast %cst_13 : f32 to vector<2x128xf32>
    %cst_14 = arith.constant 0.000000e+00 : f32
    %25 = vector.broadcast %cst_14 : f32 to vector<2x128xf32>
    %cst_15 = arith.constant 0.000000e+00 : f32
    %26 = vector.broadcast %cst_15 : f32 to vector<2x128xf32>
    %27 = arith.subf %11, %23 : vector<2x128xf32>
    %28 = math.exp %27 : vector<2x128xf32>
    %29 = arith.addf %24, %28 : vector<2x128xf32>
    %30 = arith.mulf %28, %28 : vector<2x128xf32>
    %31 = arith.addf %25, %30 : vector<2x128xf32>
    %c0_i32_16 = arith.constant 0 : i32
    %32 = vector.broadcast %c0_i32_16 : i32 to vector<2x128xi32>
    %33 = arith.cmpi eq, %8, %32 : vector<2x128xi32>
    %cst_17 = arith.constant 0.000000e+00 : f32
    %34 = vector.broadcast %cst_17 : f32 to vector<2x128xf32>
    %35 = arith.select %33, %28, %34 : vector<2x128xi1>, vector<2x128xf32>
    %36 = arith.addf %26, %35 : vector<2x128xf32>
    %37 = arith.subf %14, %23 : vector<2x128xf32>
    %38 = math.exp %37 : vector<2x128xf32>
    %39 = arith.addf %29, %38 : vector<2x128xf32>
    %40 = arith.mulf %38, %38 : vector<2x128xf32>
    %41 = arith.addf %31, %40 : vector<2x128xf32>
    %c1_i32 = arith.constant 1 : i32
    %42 = vector.broadcast %c1_i32 : i32 to vector<2x128xi32>
    %43 = arith.cmpi eq, %8, %42 : vector<2x128xi32>
    %cst_18 = arith.constant 0.000000e+00 : f32
    %44 = vector.broadcast %cst_18 : f32 to vector<2x128xf32>
    %45 = arith.select %43, %38, %44 : vector<2x128xi1>, vector<2x128xf32>
    %46 = arith.addf %36, %45 : vector<2x128xf32>
    %47 = arith.subf %17, %23 : vector<2x128xf32>
    %48 = math.exp %47 : vector<2x128xf32>
    %49 = arith.addf %39, %48 : vector<2x128xf32>
    %50 = arith.mulf %48, %48 : vector<2x128xf32>
    %51 = arith.addf %41, %50 : vector<2x128xf32>
    %c2_i32_19 = arith.constant 2 : i32
    %52 = vector.broadcast %c2_i32_19 : i32 to vector<2x128xi32>
    %53 = arith.cmpi eq, %8, %52 : vector<2x128xi32>
    %cst_20 = arith.constant 0.000000e+00 : f32
    %54 = vector.broadcast %cst_20 : f32 to vector<2x128xf32>
    %55 = arith.select %53, %48, %54 : vector<2x128xi1>, vector<2x128xf32>
    %56 = arith.addf %46, %55 : vector<2x128xf32>
    %57 = arith.subf %20, %23 : vector<2x128xf32>
    %58 = math.exp %57 : vector<2x128xf32>
    %59 = arith.addf %49, %58 : vector<2x128xf32>
    %60 = arith.mulf %58, %58 : vector<2x128xf32>
    %61 = arith.addf %51, %60 : vector<2x128xf32>
    %c3_i32 = arith.constant 3 : i32
    %62 = vector.broadcast %c3_i32 : i32 to vector<2x128xi32>
    %63 = arith.cmpi eq, %8, %62 : vector<2x128xi32>
    %cst_21 = arith.constant 0.000000e+00 : f32
    %64 = vector.broadcast %cst_21 : f32 to vector<2x128xf32>
    %65 = arith.select %63, %58, %64 : vector<2x128xi1>, vector<2x128xf32>
    %66 = arith.addf %56, %65 : vector<2x128xf32>
    %67 = arith.mulf %59, %59 : vector<2x128xf32>
    %68 = arith.mulf %66, %59 : vector<2x128xf32>
    %69 = vector.broadcast %cst_1 : f32 to vector<2x128xf32>
    %70 = arith.mulf %69, %67 : vector<2x128xf32>
    %71 = arith.addf %68, %70 : vector<2x128xf32>
    %cst_22 = arith.constant 1.000000e+00 : f32
    %72 = arith.addf %cst_22, %cst_1 : f32
    %73 = vector.broadcast %72 : f32 to vector<2x128xf32>
    %74 = arith.mulf %73, %67 : vector<2x128xf32>
    %75 = arith.addf %61, %74 : vector<2x128xf32>
    %76 = tpu.reciprocal %75 {approx = true} : vector<2x128xf32> -> vector<2x128xf32>
    %77 = arith.mulf %71, %76 : vector<2x128xf32>
    %cst_23 = arith.constant 1.000000e+00 : f32
    %78 = vector.broadcast %cst_23 : f32 to vector<2x128xf32>
    %79 = arith.subf %78, %77 : vector<2x128xf32>
    %80 = arith.addf %3, %79 : vector<2x128xf32>
    %c1_i32_24 = arith.constant 1 : i32
    %c0_25 = arith.constant 0 : index
    %c0_26 = arith.constant 0 : index
    %81 = vector.load %arg5[%c0_25, %c0_26] : memref<2x128xf32, #tpu.memory_space<vmem>>, vector<2x128xf32>
    %82 = arith.addf %81, %80 : vector<2x128xf32>
    %c0_27 = arith.constant 0 : index
    %c0_28 = arith.constant 0 : index
    %83 = vector.load %arg5[%c0_27, %c0_28] : memref<2x128xf32, #tpu.memory_space<vmem>>, vector<2x128xf32>
    tpu.vector_store %arg5[%c0_27, %c0_28], %82 {strides = array<i32>} : memref<2x128xf32, #tpu.memory_space<vmem>>, vector<2x128xf32>,
    %c0_i32_29 = arith.constant 0 : i32
    %84 = arith.cmpi eq, %arg1, %c0_i32_29 : i32
    %85 = arith.extui %84 : i1 to i32
    %c0_i32_30 = arith.constant 0 : i32
    %86 = arith.cmpi ne, %85, %c0_i32_30 : i32
    scf.if %86 {
      %c0_31 = arith.constant 0 : index
      %c0_32 = arith.constant 0 : index
      %87 = vector.load %arg5[%c0_31, %c0_32] : memref<2x128xf32, #tpu.memory_space<vmem>>, vector<2x128xf32>
      %cst_33 = arith.constant dense<0.000000e+00> : vector<128xf32>
      %88 = vector.multi_reduction <add>, %87, %cst_33 [0] : vector<2x128xf32> to vector<128xf32>
      %89 = vector.shape_cast %88 : vector<128xf32> to vector<1x128xf32>
      %90 = vector.shape_cast %89 : vector<1x128xf32> to vector<1x1x128xf32>
      %c0_34 = arith.constant 0 : index
      %c0_35 = arith.constant 0 : index
      %c0_36 = arith.constant 0 : index
      %91 = vector.load %arg4[%c0_34, %c0_35, %c0_36] : memref<1x1x128xf32, #tpu.memory_space<vmem>>, vector<1x1x128xf32>
      tpu.vector_store %arg4[%c0_34, %c0_35, %c0_36], %90 {strides = array<i32>} : memref<1x1x128xf32, #tpu.memory_space<vmem>>, vector<1x1x128xf32>,
    } else {
    }
    return
  }
  func.func @transform_0(%arg0: i32, %arg1: i32) -> (i32, i32, i32, i32) {
    %c0_i32 = arith.constant 0 : i32
    %c0_i32_0 = arith.constant 0 : i32
    %c0_i32_1 = arith.constant 0 : i32
    return %arg0, %c0_i32, %arg1, %c0_i32_0 : i32, i32, i32, i32
  }
  func.func @transform_1(%arg0: i32, %arg1: i32) -> (i32, i32, i32) {
    %c0_i32 = arith.constant 0 : i32
    %c0_i32_0 = arith.constant 0 : i32
    return %arg0, %arg1, %c0_i32 : i32, i32, i32
  }
  func.func @transform_2(%arg0: i32, %arg1: i32) -> (i32, i32, i32) {
    %c0_i32 = arith.constant 0 : i32
    %c0_i32_0 = arith.constant 0 : i32
    %c0_i32_1 = arith.constant 0 : i32
    return %arg0, %c0_i32, %c0_i32_0 : i32, i32, i32
  }
}

</mosaic_0001>

<bundles_post_ra>
// kernel: tpu_custom_call.1
= control target key start
LH: loop header
LB: loop body
LE: loop exit
PB: predicated region body
PF: predicated region fallthrough
CT: control target
= control target key end

     0   :  { %7 = vsyncpa [#allocation4], 0  ;;  %s896_s0 = inlined_call_operand.hbm [shape: f32[2,4,2,128], index: 0, kind: input, shape index: {}]   ;;  %s897_s1 = inlined_call_operand.hbm [shape: s32[2,2,128], index: 1, kind: input, shape index: {}]   ;;  %s898_s2 = inlined_call_operand.hbm [shape: f32[2,1,128], index: 2, kind: output, shape index: {}]  }
   0x1   :  { %9 = vsyncpa [#allocation4 + $0x1], 0 }
   0x2   :  { %10 = vsyncpa [#allocation7], 0 }
   0x3   :  { %12 = vsyncpa [#allocation7 + $0x1], 0 }
   0x4   :  { %13 = vsyncpa [#allocation5], 0 }
   0x5   :  { %15 = vsyncpa [#allocation5 + $0x1], 0  ;;  %s680_s9 = smov 0   ;;  %s682_s10 = smov 0  }
   0x6   :  { %s684_s11 = smov 0   ;;  %s686_s12 = smov 0  }
   0x7   :  { %s688_s13 = smov 0   ;;  %s690_s14 = smov 0  }
   0x8 LB: > { %s412_s15 = sadd.s32 4294967295, %s657_s14   ;;  %s413_s16 = sadd.s32 4294967294, %s657_s14   ;;  %s657_s14 = sphi %s690_s14, %s21_s14   ;;  %s653_s13 = sphi %s688_s13, %s917_s13   ;;  %s649_s12 = sphi %s686_s12, %s916_s12   ;;  %s645_s11 = sphi %s684_s11, %s915_s11   ;;  %s641_s10 = sphi %s682_s10, %s914_s10   ;;  %s637_s9 = sphi %s680_s9, %s913_s9  }
   0x9   : > { %s33_s17 = sadd.s32 1, %s653_s13  ;;  %s42_s18 = sadd.s32 1, %s645_s11 }
   0xa   : > { %p35_p0 = scmp.ge.s32.totalorder %s33_s17, 2  ;;  %p49_p1 = scmp.ne.s32.totalorder %s645_s11, %s641_s10 }
   0xb   : > { %p50_p2 = scmp.eq.s32.totalorder %s657_s14, 0  ;;  %p55_p3 = scmp.ne.s32.totalorder %s641_s10, %s637_s9 }
   0xc   : > { %s919_s17 = smov (%p35_p0, %s33_s17), 0  ;;  %p56_p5 = scmp.eq.s32.totalorder %s412_s15, 0 }
   0xd   : > { %p721_p4 = por %p50_p2, %p49_p1  ;;  %s37_s20 = ssub.s32 %s653_s13, %s919_s17 }
   0xe   : > { %p107_p6 = scmp.eq.s32.totalorder %s412_s15, 1  ;;  %p40_p7 = scmp.eq.s32.totalorder %s37_s20, 0 }
   0xf   : > { %p727_p8 = por %p56_p5, %p55_p3  ;;  %p113_p10 = scmp.eq.s32.totalorder %s413_s16, 1 }
  0x10   : > { %p731_p9 = por %p107_p6, %p49_p1  ;;  %p448_p13 = scmp.lt.s32.totalorder %s657_s14, 2 }
  0x11   : > { %s902_s21 = scalar_select %p727_p8, 1, 0 }
  0x12   : > { %s903_s22 = scalar_select %p731_p9, 1, 0 }
  0x13   : > { %s736_s23 = scalar_select %p40_p7, %s645_s11, %s42_s18  }
  0x14   : > { %p738_p11 = por %p113_p10, %p55_p3  ;;  %s745_s25 = sand.u32 1, %s645_s11  }
  0x15   : > { %s416_s26 = sshll.u32 %s745_s25, 3  ;;  %s430_s27 = sshll.u32 %s653_s13, 7 }
  0x16   : > { %s904_s24 = scalar_select %p738_p11, 1, 0 }
  0x17   : > { %s752_s30 = scalar_lea.hbm %s896_s0, %s430_s27  ;;  %s137_s3 = scalar_lea.vmem [#allocation3], %s416_s26 }
  0x18   : > { %s145_s4 = sshll.u32 %s137_s3, 4  ;;  %p758_p0 = pnand %p448_p13, %p721_p4  ;;  %s754_s4 = int_to_ptr.vmem [resolvable:$true] %s145_s4 }
  0x19   : > { %s134_s6 = scalar_lea.sflag [#allocation4], %s745_s25  ;;  %s511_s7 = scalar_lea.hbm %s752_s30, 128 }
  0x1a   : > { %p512_p2 = scmp.ne.s32.totalorder %s752_s30, %s511_s7  ;;  %p513_p3 = pneg %p758_p0 }
  0x1b   : > { %s516_s16 = scalar_lea.hbm %s896_s0, 256  ;;  %p517_p4 = scmp.lt.u32.totalorder %s752_s30, %s896_s0 }
  0x1c   : > { %p514_p5 = pnand %p513_p3, %p512_p2  ;;  %p518_p7 = scmp.lt.u32.totalorder %s516_s16, %s511_s7 }
  0x1d   : > { %p520_p13 = scmp.lt.u32.totalorder %s511_s7, %s752_s30 }
  0x1e   : > { %p515_p6 = pneg %p514_p5  ;;  %p519_p10 = por %p518_p7, %p517_p4 }
  0x20   : > { %p521_p12 = por %p520_p13, %p519_p10 }
  0x22   : > { %p522_p1 = pnand %p521_p12, %p515_p6 }
  0x24   : > { %525 = shalt.err (!%p522_p1)
}
  0x25   : > { %s526_s20 = scalar_lea.vmem %s754_s4, 128  ;;  %s659_s26 = smov [#allocation3]  }
  0x26   : > { %p527_p2 = scmp.ne.s32.totalorder %s754_s4, %s526_s20  ;;  %s531_s27 = sshll.u32 %s659_s26, 4  ;;  %s532_s27 = int_to_ptr.vmem [resolvable:$false] %s531_s27 }
  0x27   : > { %s533_s28 = scalar_lea.vmem %s532_s27, 256  ;;  %p534_p9 = scmp.lt.s32.totalorder %s754_s4, %s532_s27 }
  0x28   : > { %p529_p5 = pnand %p527_p2, %p513_p3  ;;  %p535_p4 = scmp.lt.s32.totalorder %s533_s28, %s526_s20 }
  0x2a   : > { %p530_p11 = pneg %p529_p5  ;;  %p536_p7 = por %p535_p4, %p534_p9 }
  0x2c   : > { %p537_p10 = pnand %p536_p7, %p530_p11 }
  0x2e   : > { %540 = shalt.err (!%p537_p10)
}
  0x2f   : > { %s660_s29 = smov 32   ;;  %s661_s3 = smov 2  }
  0x30   : > { %440 = dma.hbm_to_vmem [thread:$0]  (!%p758_p0), %s752_s30, 128, %s754_s4, %s134_s6, %s660_s29, %s660_s29, %s661_s3  }
  0x31   : > { %p172_p12 = scmp.lt.s32.totalorder %s657_s14, 3  ;;  %s419_s7 = sshll.u32 %s745_s25, 1 }
  0x32   : > { %s420_s8 = sshll.u32 %s653_s13, 5  ;;  %p906_p9 = scmp.ge.s32.totalorder %s657_s14, 1 }
  0x33   : > { %s803_s19 = scalar_lea.hbm %s897_s1, %s420_s8  ;;  %s159_s20 = scalar_lea.vmem [#allocation6], %s419_s7 }
  0x34   : > { %p796_p11 = pnand %p906_p9, %p172_p12  ;;  %s167_s26 = sshll.u32 %s159_s20, 4  ;;  %s168_s26 = int_to_ptr.vmem [resolvable:$true] %s167_s26 }
  0x35   : > { %s156_s30 = scalar_lea.sflag [#allocation7], %s745_s25  ;;  %s541_s4 = scalar_lea.hbm %s803_s19, 32 }
  0x36   : > { %s907_s15 = scalar_select %p796_p11, 1, 0 }
  0x37   : > { %p542_p1 = scmp.ne.s32.totalorder %s803_s19, %s541_s4  ;;  %s546_s28 = scalar_lea.hbm %s897_s1, 64 }
  0x38   : > { %p547_p2 = scmp.lt.u32.totalorder %s803_s19, %s897_s1  ;;  %p548_p5 = scmp.lt.u32.totalorder %s546_s28, %s541_s4 }
  0x39   : > { %p544_p6 = pnand %p542_p1, %p513_p3  ;;  %p550_p7 = scmp.lt.u32.totalorder %s541_s4, %s803_s19 }
  0x3a   : > { %p549_p4 = por %p548_p5, %p547_p2 }
  0x3b   : > { %p545_p13 = pneg %p544_p6 }
  0x3c   : > { %p551_p10 = por %p550_p7, %p549_p4 }
  0x3e   : > { %p552_p12 = pnand %p551_p10, %p545_p13 }
  0x40   : > { %555 = shalt.err (!%p552_p12)
}
  0x41   : > { %s556_s25 = scalar_lea.vmem %s168_s26, 32  ;;  %s662_s7 = smov [#allocation6]  }
  0x42   : > { %p557_p9 = scmp.ne.s32.totalorder %s168_s26, %s556_s25  ;;  %s561_s8 = sshll.u32 %s662_s7, 4  ;;  %s562_s8 = int_to_ptr.vmem [resolvable:$false] %s561_s8 }
  0x43   : > { %s563_s16 = scalar_lea.vmem %s562_s8, 64  ;;  %p564_p8 = scmp.lt.s32.totalorder %s168_s26, %s562_s8 }
  0x44   : > { %p559_p1 = pnand %p557_p9, %p513_p3  ;;  %p565_p11 = scmp.lt.s32.totalorder %s563_s16, %s556_s25 }
  0x46   : > { %p560_p6 = pneg %p559_p1  ;;  %p566_p2 = por %p565_p11, %p564_p8 }
  0x48   : > { %p567_p5 = pnand %p566_p2, %p560_p6 }
  0x4a   : > { %570 = shalt.err (!%p567_p5)
}
  0x4b   : > { %443 = dma.hbm_to_vmem [thread:$0]  (!%p758_p0), %s803_s19, 32, %s168_s26, %s156_s30  }
  0x4c   : > { %p908_p13 = scmp.ne.s32.totalorder %s907_s15, 0 }
  0x4d   : > { %s828_s18 = sand.u32 (!%p908_p13), 1, %s641_s10   ;;  %p909_p3 = scmp.ne.s32.totalorder (!%p908_p13), %s902_s21, 0 }
  0x4e   : > { %176 = sbr.rel (%p908_p13) target bundleno = 176 (0xb0), region = 28  ;;  %s422_s20 = sshll.u32 (!%p908_p13), %s828_s18, 3 }
  0x4f   : > { %s179_s4 = scalar_lea.sflag (!%p908_p13), [#allocation4], %s828_s18  ;;  %s182_s6 = scalar_lea.vmem (!%p908_p13), [#allocation3], %s422_s20 }
  0x55   : > { %624 = dma.done.wait (%p909_p3), %s179_s4, 128  }
  0x56   : > { %626 = vsyncadd (%p909_p3), %s179_s4, 4294967168  ;;  %s423_s5 = sshll.u32 %s828_s18, 1  ;;  %s188_s15 = scalar_lea.sflag [#allocation7], %s828_s18 }
  0x57   : > { %s191_s19 = scalar_lea.vmem [#allocation6], %s423_s5 }
  0x58   : > { %628 = dma.done.wait (%p909_p3), %s188_s15, 32  }
  0x59   : > { %630 = vsyncadd (%p909_p3), %s188_s15, 4294967264  ;;  %v663_v0 = vmov 0.0   ;;  %v222_v1 = vld [vmem:[%s182_s6] sm:$0x3]  ;;  %v424_v2 = vld [vmem:[%s182_s6 + $0x2] sm:$0x3] }
  0x5a   : > { %220 = vst [vmem:[#allocation2] sm:$0x3] %v663_v0  ;;  %v425_v3 = vld [vmem:[%s182_s6 + $0x4] sm:$0x3]  ;;  %v232_v4 = vmax.f32 %v222_v1, %v424_v2  ;;  %v426_v5 = vld [vmem:[%s182_s6 + $0x6] sm:$0x3] }
  0x5b   : > { %v221_v16 = vld [vmem:[%s191_s19] sm:$0x3]  ;;  %vm287_vm4 = vcmask 1041408   ;;  %s215_s21 = scalar_lea.vmem [#allocation8], %s828_s18  ;;  %s427_s30 = sshll.u32 %s649_s12, 4 }
  0x5c   : > { %v233_v6 = vmax.f32 %v232_v4, %v425_v3  ;;  %vm241_vm0 = vcmp.eq.s32.totalorder %v221_v16, 0  ;;  %vm250_vm1 = vcmp.eq.s32.totalorder %v221_v16, 1  ;;  %vm259_vm2 = vcmp.eq.s32.totalorder %v221_v16, 2  ;;  %s309_s26 = sshll.u32 %s215_s21, 4  ;;  %s849_s29 = scalar_lea.hbm %s898_s2, %s427_s30  ;;  %s844_s26 = int_to_ptr.vmem [resolvable:$true] %s309_s26 }
  0x5d   : > { %vm268_vm3 = vcmp.eq.s32.totalorder %v221_v16, 3  ;;  %s297_s3 = scalar_lea.sflag [#allocation5], %s828_s18  ;;  %s571_s25 = scalar_lea.vmem %s844_s26, 16 }
  0x5e   : > { %v234_v7 = vmax.f32 %v233_v6, %v426_v5  ;;  %p572_p8 = scmp.ne.s32.totalorder %s844_s26, %s571_s25  ;;  %p910_p0 = scmp.ne.s32.totalorder %s903_s22, 0 }
  0x5f   : > { %s664_s12 = smov [#allocation8]  }
  0x60   : > { %v235_v8 = vsub.f32 %v222_v1, %v234_v7  ;;  %v244_v9 = vsub.f32 %v424_v2, %v234_v7  ;;  %v253_v10 = vsub.f32 %v425_v3, %v234_v7  ;;  %v262_v11 = vsub.f32 %v426_v5, %v234_v7  ;;  %p573_p11 = pnand %p572_p8, %p910_p0  ;;  %s575_s7 = sshll.u32 %s664_s12, 4  ;;  %s576_s7 = int_to_ptr.vmem [resolvable:$false] %s575_s7 }
  0x61   : > { %v280_v45 = vld [vmem:[#allocation2] sm:$0x3]  ;;  %s577_s8 = scalar_lea.vmem %s576_s7, 32  ;;  %p578_p7 = scmp.lt.s32.totalorder %s844_s26, %s576_s7 }
  0x62   : > { %v236_v12 = vmul.f32 1.442695, %v235_v8  ;;  %v245_v13 = vmul.f32 1.442695, %v244_v9  ;;  %v254_v14 = vmul.f32 1.442695, %v253_v10  ;;  %p574_p4 = pneg %p573_p11  ;;  %p579_p10 = scmp.lt.s32.totalorder %s577_s8, %s571_s25 }
  0x63   : > { %v263_v15 = vmul.f32 1.442695, %v262_v11 }
  0x64   : > { %501 = vpow2.f32 %v236_v12  ;;  %p580_p12 = por %p579_p10, %p578_p7 }
  0x65   : > { %503 = vpow2.f32 %v245_v13 }
  0x66   : > { %505 = vpow2.f32 %v254_v14  ;;  %p581_p9 = pnand %p580_p12, %p574_p4 }
  0x67   : > { %507 = vpow2.f32 %v263_v15 }
  0x6e   : > { %v502_v17 = vpop.eup %501 }
  0x6f   : > { %v504_v18 = vpop.eup %503  ;;  %v239_v19 = vmul.f32 %v502_v17, %v502_v17  ;;  %v242_v21 = vsel %vm241_vm0, %v502_v17, 0.0 }
  0x70   : > { %v506_v20 = vpop.eup %505  ;;  %v247_v22 = vadd.f32 %v504_v18, %v502_v17  ;;  %v248_v23 = vmul.f32 %v504_v18, %v504_v18  ;;  %v251_v24 = vsel %vm250_vm1, %v504_v18, 0.0 }
  0x71   : > { %v508_v25 = vpop.eup %507  ;;  %v257_v26 = vmul.f32 %v506_v20, %v506_v20  ;;  %v252_v30 = vadd.f32 %v251_v24, %v242_v21  ;;  %v260_v32 = vsel %vm259_vm2, %v506_v20, 0.0 }
  0x72   : > { %v249_v27 = vadd.f32 %v248_v23, %v239_v19  ;;  %v256_v28 = vadd.f32 %v506_v20, %v247_v22  ;;  %v266_v29 = vmul.f32 %v508_v25, %v508_v25  ;;  %v269_v37 = vsel %vm268_vm3, %v508_v25, 0.0 }
  0x73   : > { %v261_v36 = vadd.f32 %v260_v32, %v252_v30 }
  0x74   : > { %v258_v31 = vadd.f32 %v257_v26, %v249_v27  ;;  %v265_v33 = vadd.f32 %v508_v25, %v256_v28 }
  0x75   : > { %v270_v40 = vadd.f32 %v269_v37, %v261_v36 }
  0x76   : > { %v267_v34 = vadd.f32 %v266_v29, %v258_v31  ;;  %v271_v35 = vmul.f32 %v265_v33, %v265_v33 }
  0x77   : > { %v272_v41 = vmul.f32 %v270_v40, %v265_v33 }
  0x78   : > { %v274_v38 = vmul.f32 2.0, %v271_v35 }
  0x79   : > { %v273_v42 = vadd.f32 %v272_v41, %v271_v35 }
  0x7a   : > { %v275_v39 = vadd.f32 %v274_v38, %v267_v34 }
  0x7c   : > { %509 = vrcp.f32 %v275_v39 }
  0x86   : > { %v510_v43 = vpop.eup %509 }
  0x87   : > { %v277_v44 = vmul.f32 %v510_v43, %v273_v42 }
  0x89   : > { %v278_v46 = vsub.f32 1.0, %v277_v44 }
  0x8b   : > { %v281_v47 = vadd.f32 %v280_v45, %v278_v46 }
  0x8d   : > { %282 = vst [vmem:[#allocation2] sm:$0x3] %v281_v47 }
  0x94   : > { %v286_v48 = vld [vmem:[#allocation2] sm:$0x3] }
  0x95   : > { %v288_v49 = vsel %vm287_vm4, %v286_v48, 0.0 }
  0x96   : > { %v289_v50 = vrot.slane %v288_v49, 4 }
  0x98   : > { %v290_v51 = vadd.f32 %v289_v50, %v288_v49 }
  0x9a   : > { %v291_v52 = vrot.slane %v290_v51, 2 }
  0x9c   : > { %v292_v53 = vadd.f32 %v291_v52, %v290_v51 }
  0x9e   : > { %v293_v54 = vrot.slane %v292_v53, 1 }
  0xa0   : > { %v294_v55 = vadd.f32 %v293_v54, %v292_v53 }
  0xa2   : > { %295 = vst [vmem:[%s215_s21] sm:$0x1] %v294_v55 }
  0xa3   : > { %584 = shalt.err (!%p581_p9)
}
  0xa4   : > { %s585_s16 = scalar_lea.hbm %s849_s29, 16  ;;  %s589_s4 = scalar_lea.hbm %s898_s2, 32 }
  0xa5   : > { %p586_p1 = scmp.ne.s32.totalorder %s849_s29, %s585_s16  ;;  %p590_p5 = scmp.lt.u32.totalorder %s849_s29, %s898_s2 }
  0xa6   : > { %p591_p13 = scmp.lt.u32.totalorder %s589_s4, %s585_s16  ;;  %p593_p8 = scmp.lt.u32.totalorder %s585_s16, %s849_s29 }
  0xa7   : > { %p587_p6 = pnand %p586_p1, %p910_p0 }
  0xa8   : > { %p592_p3 = por %p591_p13, %p590_p5 }
  0xa9   : > { %p588_p2 = pneg %p587_p6 }
  0xaa   : > { %p594_p11 = por %p593_p8, %p592_p3 }
  0xac   : > { %p595_p4 = pnand %p594_p11, %p588_p2 }
  0xae   : > { %598 = shalt.err (!%p595_p4)
}
  0xaf   : > { %435 = dma.vmem_to_hbm [thread:$0]  (%p910_p0), %s844_s26, 16, %s849_s29, %s297_s3  }
  0xb0 PF: > { %s321_s15 = sand.u32 1, %s637_s9   ;;  %p911_p7 = scmp.ne.s32.totalorder %s904_s24, 0 }
  0xb1   : > { %p912_p10 = scmp.ge.s32.totalorder %s657_s14, 2  ;;  %s322_s19 = scalar_lea.sflag [#allocation5], %s321_s15 }
  0xb3   : > { %p445_p12 = pnand %p912_p10, %p911_p7 }
  0xb5   : > { %632 = dma.done.wait (!%p445_p12), %s322_s19, 16  }
  0xb6   : > { %634 = vsyncadd (!%p445_p12), %s322_s19, 4294967280  ;;  %s21_s14 = sadd.s32 1, %s657_s14   ;;  %s913_s9 = smov %s641_s10 }
  0xb7   : > { %p18_p9 = scmp.ge.s32.totalorder %s21_s14, 4   ;;  %s914_s10 = smov %s645_s11 }
  0xb8   : > { %s915_s11 = smov %s736_s23  ;;  %s916_s12 = smov %s653_s13 }
  0xb9   : > { %s917_s13 = smov %s919_s17  ;;  %20 = sbr.rel (!%p18_p9) target bundleno = 8 (0x8), region = 97 }
  0xc0   :  { %326 = vsyncpa [#allocation4], 1 }
  0xc1   :  { %328 = vsyncpa [#allocation4 + $0x1], 1 }
  0xc2   :  { %329 = vsyncpa [#allocation7], 1 }
  0xc3   :  { %331 = vsyncpa [#allocation7 + $0x1], 1 }
  0xc4   :  { %332 = vsyncpa [#allocation5], 1 }
  0xc5   :  { %334 = vsyncpa [#allocation5 + $0x1], 1 }

</bundles_post_ra>
